<compile_context>
chip_gen: v7x
topology: tpu7x:2x2x1
jax: 0.10.0
libtpu: 0.0.40
codegen_flags: <defaults>
</compile_context>

<pallas_src>
import functools

import jax
import jax.numpy as jnp
from jax.experimental import pallas as pl
from jax.experimental.pallas import tpu as pltpu


def _cdiv(a, b):
    return -(-a // b)


def _round_up(x, m):
    return ((x + m - 1) // m) * m


def _critic_kernel(s_ref, a_ref,
                   w1_ref, b1_ref,
                   w2x_ref, w2a_ref, b2_ref,
                   w3_ref, b3_ref,
                   o_ref, *, compute_dtype, action_on_vpu):
    # fc1 + relu.  Weights arrive pre-cast to compute_dtype from the wrapper;
    # only the per-tile activations are cast here (proportional to data).
    s = s_ref[...].astype(compute_dtype)
    x = jnp.dot(s, w1_ref[...], preferred_element_type=jnp.float32)
    x = jnp.maximum(x + b1_ref[...], 0.0)

    # fc2 on the implicit concat([x, action]):  x @ W2_x + a @ W2_a + b2.
    h = jnp.dot(x.astype(compute_dtype), w2x_ref[...],
                preferred_element_type=jnp.float32)
    if action_on_vpu:
        # Tiny K (action_size) contraction: keep it off the MXU; a few f32
        # broadcast multiply-adds on the VPU (which has slack here).
        a = a_ref[...]                        # (tb, A)  f32
        w2a = w2a_ref[...]                    # (A, F2)  f32
        for k in range(a.shape[1]):           # static, small unrolled loop
            h = h + a[:, k:k + 1] * w2a[k:k + 1, :]
    else:
        h = h + jnp.dot(a_ref[...].astype(compute_dtype),
                        w2a_ref[...].astype(compute_dtype),
                        preferred_element_type=jnp.float32)
    h = jnp.maximum(h + b2_ref[...], 0.0)

    # fc3 (output dim = 1): VPU multiply + XLU lane reduction (no N=1 MXU
    # pass).  Store lane-dense as a (1, tb) row.
    q = jnp.sum(h * w3_ref[...], axis=-1)     # (tb,)
    o_ref[...] = jnp.reshape(q + b3_ref[0, 0], (1, q.shape[0]))


def _choose_tiling(B, block_b):
    """Pick (n_tiles, tb): tb multiple of 8, padding <= 8 rows per step,
    and >= 2 grid steps when B >= 16 so v7x's 2 TensorCores both get work."""
    n = _cdiv(B, block_b)
    if B >= 16:
        n = max(n, 2)
    tb = _round_up(_cdiv(B, n), 8)
    return n, tb


def critic_forward(state, action, params, *, block_b=2048,
                   compute_dtype=jnp.bfloat16):
    """Critic forward pass as a single batch-tiled Pallas kernel.

    state : (B, state_size) f32
    action: (B, action_size) f32
    params: dict with
        w1     (S,  F1)   b1 (1, F1)
        w2x    (F1, F2)   w2a (A, F2)   b2 (1, F2)
        w3_row (1,  F2)   b3 (1, 1)
    Returns (B, 1) f32 Q-values.
    """
    B, S = state.shape
    A = action.shape[1]
    F1 = params["w1"].shape[1]
    F2 = params["w2x"].shape[1]

    n_tiles, tb = _choose_tiling(B, block_b)
    b_pad = n_tiles * tb
    if b_pad != B:
        pad = b_pad - B
        state = jnp.pad(state, ((0, pad), (0, 0)))
        action = jnp.pad(action, ((0, pad), (0, 0)))
        # TODO(synk): a masked tail tile / separate tail call would avoid the
        # jnp.pad copy entirely; padding itself is <= 8 rows per grid step.

    # VMEM sanity: double-buffered state/action/output tiles (weights are
    # ~0.1 MB and constant).  Stays far under the 32 MiB default scoped VMEM
    # on v5e/v6e/v7x even at tb=4096, so one tile size works on all gens.
    per_step_tile_bytes = 2 * (tb * S * 4 + tb * A * 4 + tb * 4)
    assert per_step_tile_bytes < 16 * 1024 * 1024, "batch tile too large"

    # Grid-invariant weights: cast ONCE in the wrapper (not per grid step).
    w1 = params["w1"].astype(compute_dtype)
    w2x = params["w2x"].astype(compute_dtype)
    w2a = params["w2a"]                        # stays f32 (VPU path for small A)
    action_on_vpu = A <= 8

    kernel = functools.partial(_critic_kernel, compute_dtype=compute_dtype,
                               action_on_vpu=action_on_vpu)

    out = pl.pallas_call(
        kernel,
        out_shape=jax.ShapeDtypeStruct((n_tiles, tb), jnp.float32),
        grid=(n_tiles,),
        in_specs=[
            # Batch-tiled operands.
            pl.BlockSpec((tb, S), lambda i: (i, 0)),
            pl.BlockSpec((tb, A), lambda i: (i, 0)),
            # Weights / biases pinned in VMEM across all grid iterations.
            pl.BlockSpec((S, F1), lambda i: (0, 0)),
            pl.BlockSpec((1, F1), lambda i: (0, 0)),
            pl.BlockSpec((F1, F2), lambda i: (0, 0)),
            pl.BlockSpec((A, F2), lambda i: (0, 0)),
            pl.BlockSpec((1, F2), lambda i: (0, 0)),
            pl.BlockSpec((1, F2), lambda i: (0, 0)),
            # fc3 bias: scalar in SMEM.
            pl.BlockSpec(memory_space=pltpu.MemorySpace.SMEM),
        ],
        # Lane-dense output: one (1, tb) row per grid step.
        out_specs=pl.BlockSpec((1, tb), lambda i: (i, 0)),
        compiler_params=pltpu.CompilerParams(
            dimension_semantics=("parallel",)),
    )(state, action,
      w1, params["b1"],
      w2x, w2a, params["b2"],
      params["w3_row"], params["b3"])

    return out.reshape(-1)[:B].reshape(B, 1)


def init_critic_params(key, state_size, action_size, fc1_units=128, fc2_units=128):
    """Parameter init mirroring the PyTorch module (xavier weights, default
    nn.Linear uniform biases).  Weights stored (in, out); w3 stored as a
    (1, fc2) row for the VPU reduction."""
    k1, k2, k3, kb1, kb2, kb3 = jax.random.split(key, 6)

    def xavier_normal(k, fan_in, fan_out):
        std = (2.0 / (fan_in + fan_out)) ** 0.5
        return std * jax.random.normal(k, (fan_in, fan_out), dtype=jnp.float32)

    def xavier_uniform(k, fan_in, fan_out):
        limit = (6.0 / (fan_in + fan_out)) ** 0.5
        return jax.random.uniform(k, (fan_in, fan_out), dtype=jnp.float32,
                                  minval=-limit, maxval=limit)

    def bias_init(k, fan_in, fan_out):
        bound = 1.0 / (fan_in ** 0.5)
        return jax.random.uniform(k, (1, fan_out), dtype=jnp.float32,
                                  minval=-bound, maxval=bound)

    fc2_in = fc1_units + action_size
    w2_full = xavier_normal(k2, fc2_in, fc2_units)          # (fc1+A, fc2)
    w3 = xavier_uniform(k3, fc2_units, 1)                   # (fc2, 1)
    return {
        "w1": xavier_normal(k1, state_size, fc1_units),
        "b1": bias_init(kb1, state_size, fc1_units),
        "w2x": w2_full[:fc1_units, :],                      # state-path half of W2
        "w2a": w2_full[fc1_units:, :],                      # action-path half of W2
        "b2": bias_init(kb2, fc2_in, fc2_units),
        "w3_row": w3.T,                                     # (1, fc2)
        "b3": bias_init(kb3, fc2_units, 1),                 # (1, 1)
    }


def critic_reference(state, action, params):
    """Pure-JAX reference (mirrors the PyTorch forward)."""
    x = jnp.maximum(state @ params["w1"] + params["b1"], 0.0)
    x = jnp.concatenate([x, action], axis=1)
    w2 = jnp.concatenate([params["w2x"], params["w2a"]], axis=0)
    x = jnp.maximum(x @ w2 + params["b2"], 0.0)
    return x @ params["w3_row"].T + params["b3"]


if __name__ == "__main__":
    STATE_SIZE, ACTION_SIZE = 32, 4
    FC1, FC2 = 128, 128

    key = jax.random.PRNGKey(0)
    k_state, k_action, k_params, k_s2, k_a2 = jax.random.split(key, 5)
    params = init_critic_params(k_params, STATE_SIZE, ACTION_SIZE, FC1, FC2)

    # 1) Small batch (single grid step), f32 compute -> tight tolerance.
    B = 8
    state = jax.random.normal(k_state, (B, STATE_SIZE), dtype=jnp.float32)
    action = jax.random.normal(k_action, (B, ACTION_SIZE), dtype=jnp.float32)
    q = jax.block_until_ready(
        critic_forward(state, action, params, compute_dtype=jnp.float32))
    q_ref = critic_reference(state, action, params)
    assert q.shape == (B, 1)
    assert jnp.allclose(q, q_ref, atol=1e-4, rtol=1e-4), "f32 small-batch mismatch"

    # 2) Ragged batch (multi-tile grid + tail padding), f32 compute, tight tol.
    B2 = 300
    state2 = jax.random.normal(k_s2, (B2, STATE_SIZE), dtype=jnp.float32)
    action2 = jax.random.normal(k_a2, (B2, ACTION_SIZE), dtype=jnp.float32)
    q2 = jax.block_until_ready(
        critic_forward(state2, action2, params, block_b=128,
                       compute_dtype=jnp.float32))
    q2_ref = critic_reference(state2, action2, params)
    assert q2.shape == (B2, 1)
    assert jnp.allclose(q2, q2_ref, atol=1e-4, rtol=1e-4), "f32 tiled mismatch"

    # 3) Default (bf16 MXU operands, f32 accumulation) -> loose tolerance.
    q3 = jax.block_until_ready(critic_forward(state2, action2, params))
    assert q3.shape == (B2, 1)
    assert jnp.allclose(q3, q2_ref, atol=1e-1, rtol=1e-1), "bf16 tiled mismatch"

    print("KERNEL_OK")
</pallas_src>

<mosaic_0001>
module attributes {stable_mosaic.version = 11 : i64} {
  func.func @_critic_kernel(%arg0: i32, %arg1: memref<8x32xf32, #tpu.memory_space<vmem>>, %arg2: memref<8x4xf32, #tpu.memory_space<vmem>>, %arg3: memref<32x128xf32, #tpu.memory_space<vmem>>, %arg4: memref<1x128xf32, #tpu.memory_space<vmem>>, %arg5: memref<128x128xf32, #tpu.memory_space<vmem>>, %arg6: memref<4x128xf32, #tpu.memory_space<vmem>>, %arg7: memref<1x128xf32, #tpu.memory_space<vmem>>, %arg8: memref<1x128xf32, #tpu.memory_space<vmem>>, %arg9: memref<1x1xf32, #tpu.memory_space<smem>>, %arg10: memref<1x8xf32, #tpu.memory_space<vmem>>) attributes {dimension_semantics = [#tpu.dimension_semantics<parallel>], iteration_bounds = array<i64: 1>, scalar_prefetch = 0 : i64, scratch_operands = 0 : i64, tpu.core_type = #tpu.core_type<tc>, window_params = [{transform_indices = @transform_0, window_bounds = array<i64: 8, 32>}, {transform_indices = @transform_1, window_bounds = array<i64: 8, 4>}, {pipeline_mode = #tpu.pipeline_mode<synchronous>, transform_indices = @transform_2, window_bounds = array<i64: 32, 128>}, {pipeline_mode = #tpu.pipeline_mode<synchronous>, transform_indices = @transform_3, window_bounds = array<i64: 1, 128>}, {pipeline_mode = #tpu.pipeline_mode<synchronous>, transform_indices = @transform_4, window_bounds = array<i64: 128, 128>}, {pipeline_mode = #tpu.pipeline_mode<synchronous>, transform_indices = @transform_5, window_bounds = array<i64: 4, 128>}, {pipeline_mode = #tpu.pipeline_mode<synchronous>, transform_indices = @transform_6, window_bounds = array<i64: 1, 128>}, {pipeline_mode = #tpu.pipeline_mode<synchronous>, transform_indices = @transform_7, window_bounds = array<i64: 1, 128>}, {transform_indices = @transform_8, window_bounds = array<i64: 1, 1>}, {transform_indices = @transform_9, window_bounds = array<i64: 1, 8>}]} {
    %c0 = arith.constant 0 : index
    %c0_0 = arith.constant 0 : index
    %0 = vector.load %arg1[%c0, %c0_0] : memref<8x32xf32, #tpu.memory_space<vmem>>, vector<8x32xf32>
    %c0_1 = arith.constant 0 : index
    %c0_2 = arith.constant 0 : index
    %1 = vector.load %arg3[%c0_1, %c0_2] : memref<32x128xf32, #tpu.memory_space<vmem>>, vector<32x128xf32>
    %cst = arith.constant dense<0.000000e+00> : vector<8x128xf32>
    %2 = tpu.matmul %0, %1, %cst {dimension_numbers = #tpu.dot_dimension_numbers<[1], [0], [0], [1], [0, 0, 1, 1], [], []>} : vector<8x32xf32>, vector<32x128xf32>, vector<8x128xf32> -> vector<8x128xf32>
    %c0_3 = arith.constant 0 : index
    %c0_4 = arith.constant 0 : index
    %3 = vector.load %arg4[%c0_3, %c0_4] : memref<1x128xf32, #tpu.memory_space<vmem>>, vector<1x128xf32>
    %4 = vector.broadcast %3 : vector<1x128xf32> to vector<8x128xf32>
    %5 = arith.addf %2, %4 : vector<8x128xf32>
    %cst_5 = arith.constant 0.000000e+00 : f32
    %6 = vector.broadcast %cst_5 : f32 to vector<8x128xf32>
    %7 = arith.maximumf %5, %6 : vector<8x128xf32>
    %c0_6 = arith.constant 0 : index
    %c0_7 = arith.constant 0 : index
    %8 = vector.load %arg5[%c0_6, %c0_7] : memref<128x128xf32, #tpu.memory_space<vmem>>, vector<128x128xf32>
    %cst_8 = arith.constant dense<0.000000e+00> : vector<8x128xf32>
    %9 = tpu.matmul %7, %8, %cst_8 {dimension_numbers = #tpu.dot_dimension_numbers<[1], [0], [0], [1], [0, 0, 1, 1], [], []>} : vector<8x128xf32>, vector<128x128xf32>, vector<8x128xf32> -> vector<8x128xf32>
    %c0_9 = arith.constant 0 : index
    %c0_10 = arith.constant 0 : index
    %10 = vector.load %arg2[%c0_9, %c0_10] : memref<8x4xf32, #tpu.memory_space<vmem>>, vector<8x4xf32>
    %c0_11 = arith.constant 0 : index
    %c0_12 = arith.constant 0 : index
    %11 = vector.load %arg6[%c0_11, %c0_12] : memref<4x128xf32, #tpu.memory_space<vmem>>, vector<4x128xf32>
    %12 = vector.extract_strided_slice %10 {offsets = [0, 0], sizes = [8, 1], strides = [1, 1]} : vector<8x4xf32> to vector<8x1xf32>
    %13 = vector.extract_strided_slice %11 {offsets = [0, 0], sizes = [1, 128], strides = [1, 1]} : vector<4x128xf32> to vector<1x128xf32>
    %14 = vector.broadcast %12 : vector<8x1xf32> to vector<8x128xf32>
    %15 = vector.broadcast %13 : vector<1x128xf32> to vector<8x128xf32>
    %16 = arith.mulf %14, %15 : vector<8x128xf32>
    %17 = arith.addf %9, %16 : vector<8x128xf32>
    %18 = vector.extract_strided_slice %10 {offsets = [0, 1], sizes = [8, 1], strides = [1, 1]} : vector<8x4xf32> to vector<8x1xf32>
    %19 = vector.extract_strided_slice %11 {offsets = [1, 0], sizes = [1, 128], strides = [1, 1]} : vector<4x128xf32> to vector<1x128xf32>
    %20 = vector.broadcast %18 : vector<8x1xf32> to vector<8x128xf32>
    %21 = vector.broadcast %19 : vector<1x128xf32> to vector<8x128xf32>
    %22 = arith.mulf %20, %21 : vector<8x128xf32>
    %23 = arith.addf %17, %22 : vector<8x128xf32>
    %24 = vector.extract_strided_slice %10 {offsets = [0, 2], sizes = [8, 1], strides = [1, 1]} : vector<8x4xf32> to vector<8x1xf32>
    %25 = vector.extract_strided_slice %11 {offsets = [2, 0], sizes = [1, 128], strides = [1, 1]} : vector<4x128xf32> to vector<1x128xf32>
    %26 = vector.broadcast %24 : vector<8x1xf32> to vector<8x128xf32>
    %27 = vector.broadcast %25 : vector<1x128xf32> to vector<8x128xf32>
    %28 = arith.mulf %26, %27 : vector<8x128xf32>
    %29 = arith.addf %23, %28 : vector<8x128xf32>
    %30 = vector.extract_strided_slice %10 {offsets = [0, 3], sizes = [8, 1], strides = [1, 1]} : vector<8x4xf32> to vector<8x1xf32>
    %31 = vector.extract_strided_slice %11 {offsets = [3, 0], sizes = [1, 128], strides = [1, 1]} : vector<4x128xf32> to vector<1x128xf32>
    %32 = vector.broadcast %30 : vector<8x1xf32> to vector<8x128xf32>
    %33 = vector.broadcast %31 : vector<1x128xf32> to vector<8x128xf32>
    %34 = arith.mulf %32, %33 : vector<8x128xf32>
    %35 = arith.addf %29, %34 : vector<8x128xf32>
    %c0_13 = arith.constant 0 : index
    %c0_14 = arith.constant 0 : index
    %36 = vector.load %arg7[%c0_13, %c0_14] : memref<1x128xf32, #tpu.memory_space<vmem>>, vector<1x128xf32>
    %37 = vector.broadcast %36 : vector<1x128xf32> to vector<8x128xf32>
    %38 = arith.addf %35, %37 : vector<8x128xf32>
    %cst_15 = arith.constant 0.000000e+00 : f32
    %39 = vector.broadcast %cst_15 : f32 to vector<8x128xf32>
    %40 = arith.maximumf %38, %39 : vector<8x128xf32>
    %c0_16 = arith.constant 0 : index
    %c0_17 = arith.constant 0 : index
    %41 = vector.load %arg8[%c0_16, %c0_17] : memref<1x128xf32, #tpu.memory_space<vmem>>, vector<1x128xf32>
    %42 = vector.broadcast %41 : vector<1x128xf32> to vector<8x128xf32>
    %43 = arith.mulf %40, %42 : vector<8x128xf32>
    %cst_18 = arith.constant dense<0.000000e+00> : vector<8xf32>
    %44 = vector.multi_reduction <add>, %43, %cst_18 [1] : vector<8x128xf32> to vector<8xf32>
    %c0_19 = arith.constant 0 : index
    %c0_20 = arith.constant 0 : index
    %45 = memref.load %arg9[%c0_19, %c0_20] : memref<1x1xf32, #tpu.memory_space<smem>>
    %46 = vector.broadcast %45 : f32 to vector<8xf32>
    %47 = arith.addf %44, %46 : vector<8xf32>
    %48 = vector.shape_cast %47 : vector<8xf32> to vector<1x8xf32>
    %c0_21 = arith.constant 0 : index
    %c0_22 = arith.constant 0 : index
    %49 = vector.load %arg10[%c0_21, %c0_22] : memref<1x8xf32, #tpu.memory_space<vmem>>, vector<1x8xf32>
    tpu.vector_store %arg10[%c0_21, %c0_22], %48 {strides = array<i32>} : memref<1x8xf32, #tpu.memory_space<vmem>>, vector<1x8xf32>,
    return
  }
  func.func @transform_0(%arg0: i32) -> (i32, i32) {
    %c0_i32 = arith.constant 0 : i32
    %c0_i32_0 = arith.constant 0 : i32
    return %arg0, %c0_i32 : i32, i32
  }
  func.func @transform_1(%arg0: i32) -> (i32, i32) {
    %c0_i32 = arith.constant 0 : i32
    %c0_i32_0 = arith.constant 0 : i32
    return %arg0, %c0_i32 : i32, i32
  }
  func.func @transform_2(%arg0: i32) -> (i32, i32) {
    %c0_i32 = arith.constant 0 : i32
    %c0_i32_0 = arith.constant 0 : i32
    %c0_i32_1 = arith.constant 0 : i32
    return %c0_i32, %c0_i32_0 : i32, i32
  }
  func.func @transform_3(%arg0: i32) -> (i32, i32) {
    %c0_i32 = arith.constant 0 : i32
    %c0_i32_0 = arith.constant 0 : i32
    %c0_i32_1 = arith.constant 0 : i32
    return %c0_i32, %c0_i32_0 : i32, i32
  }
  func.func @transform_4(%arg0: i32) -> (i32, i32) {
    %c0_i32 = arith.constant 0 : i32
    %c0_i32_0 = arith.constant 0 : i32
    %c0_i32_1 = arith.constant 0 : i32
    return %c0_i32, %c0_i32_0 : i32, i32
  }
  func.func @transform_5(%arg0: i32) -> (i32, i32) {
    %c0_i32 = arith.constant 0 : i32
    %c0_i32_0 = arith.constant 0 : i32
    %c0_i32_1 = arith.constant 0 : i32
    return %c0_i32, %c0_i32_0 : i32, i32
  }
  func.func @transform_6(%arg0: i32) -> (i32, i32) {
    %c0_i32 = arith.constant 0 : i32
    %c0_i32_0 = arith.constant 0 : i32
    %c0_i32_1 = arith.constant 0 : i32
    return %c0_i32, %c0_i32_0 : i32, i32
  }
  func.func @transform_7(%arg0: i32) -> (i32, i32) {
    %c0_i32 = arith.constant 0 : i32
    %c0_i32_0 = arith.constant 0 : i32
    %c0_i32_1 = arith.constant 0 : i32
    return %c0_i32, %c0_i32_0 : i32, i32
  }
  func.func @transform_8(%arg0: i32) -> (i32, i32) {
    %c0_i32 = arith.constant 0 : i32
    %c0_i32_0 = arith.constant 0 : i32
    %c0_i32_1 = arith.constant 0 : i32
    return %c0_i32, %c0_i32_0 : i32, i32
  }
  func.func @transform_9(%arg0: i32) -> (i32, i32) {
    %c0_i32 = arith.constant 0 : i32
    %c0_i32_0 = arith.constant 0 : i32
    return %arg0, %c0_i32 : i32, i32
  }
}

</mosaic_0001>

<bundles_post_ra>
// kernel: tpu_custom_call.1
= control target key start
LH: loop header
LB: loop body
LE: loop exit
PB: predicated region body
PF: predicated region fallthrough
CT: control target
= control target key end

     0   :  { %15 = vsyncpa [#allocation4], 0  ;;  %s635_s0 = inlined_call_operand.vmem [shape: f32[8,32], index: 0, kind: input, shape index: {}]   ;;  %s636_s1 = inlined_call_operand.vmem [shape: f32[8,4], index: 1, kind: input, shape index: {}]   ;;  %s637_s2 = inlined_call_operand.hbm [shape: f32[32,128], index: 2, kind: input, shape index: {}]   ;;  %s638_s3 = inlined_call_operand.vmem [shape: f32[1,128], index: 3, kind: input, shape index: {}]   ;;  %s639_s4 = inlined_call_operand.hbm [shape: f32[128,128], index: 4, kind: input, shape index: {}]   ;;  %s640_s5 = inlined_call_operand.vmem [shape: f32[4,128], index: 5, kind: input, shape index: {}]   ;;  %s641_s6 = inlined_call_operand.vmem [shape: f32[1,128], index: 6, kind: input, shape index: {}]   ;;  %s642_s7 = inlined_call_operand.vmem [shape: f32[1,128], index: 7, kind: input, shape index: {}]   ;;  %s643_s8 = inlined_call_operand.<no memory space> [shape: f32[1,1], index: 8, kind: input, shape index: {}]   ;;  %s644_s9 = inlined_call_operand.hbm [shape: f32[1,8], index: 9, kind: output, shape index: {}]  }
   0x1   :  { %16 = vsyncpa [#allocation7], 0 }
   0x2   :  { %17 = vsyncpa [#allocation5], 0  ;;  %s516_s30 = smov [#allocation3]   ;;  %s444_s13 = scalar_lea.hbm %s637_s2, 512 }
   0x3   :  { %s27_s10 = sshll.u32 %s516_s30, 4  ;;  %p445_p0 = scmp.ne.s32.totalorder %s637_s2, %s444_s13  ;;  %s28_s10 = int_to_ptr.vmem [resolvable:$true] %s27_s10 }
   0x4   :  { %p448_p1 = scmp.lt.u32.totalorder %s444_s13, %s637_s2 }
   0x6   :  { %p450_p2 = pnand %p448_p1, %p445_p0 }
   0x8   :  { %453 = shalt.err (!%p450_p2)
}
   0x9   :  { %s454_s18 = scalar_lea.vmem %s28_s10, 512  ;;  %p459_p4 = scmp.lt.s32.totalorder %s28_s10, %s28_s10 }
   0xa   :  { %p455_p3 = scmp.ne.s32.totalorder %s28_s10, %s454_s18  ;;  %p460_p5 = scmp.lt.s32.totalorder %s454_s18, %s454_s18 }
   0xc   :  { %p461_p6 = por %p460_p5, %p459_p4 }
   0xe   :  { %p462_p7 = pnand %p461_p6, %p455_p3 }
  0x10   :  { %465 = shalt.err (!%p462_p7)
}
  0x11   :  { %s517_s19 = smov 128   ;;  %s518_s20 = smov 8  }
  0x12   :  { %33 = dma.hbm_to_vmem [thread:$0]  %s637_s2, 512, %s28_s10, [#allocation4], %s517_s19, %s517_s19, %s518_s20  }
  0x13   :  { %s519_s23 = smov [#allocation6]   ;;  %s466_s27 = scalar_lea.hbm %s639_s4, 2048 }
  0x14   :  { %s41_s24 = sshll.u32 %s519_s23, 4  ;;  %p467_p8 = scmp.ne.s32.totalorder %s639_s4, %s466_s27  ;;  %s42_s24 = int_to_ptr.vmem [resolvable:$true] %s41_s24 }
  0x15   :  { %p470_p9 = scmp.lt.u32.totalorder %s466_s27, %s639_s4 }
  0x17   :  { %p472_p10 = pnand %p470_p9, %p467_p8 }
  0x19   :  { %475 = shalt.err (!%p472_p10)
}
  0x1a   :  { %s476_s12 = scalar_lea.vmem %s42_s24, 2048  ;;  %p481_p12 = scmp.lt.s32.totalorder %s42_s24, %s42_s24 }
  0x1b   :  { %p477_p11 = scmp.ne.s32.totalorder %s42_s24, %s476_s12  ;;  %p482_p13 = scmp.lt.s32.totalorder %s476_s12, %s476_s12 }
  0x1d   :  { %p483_p0 = por %p482_p13, %p481_p12 }
  0x1f   :  { %p484_p1 = pnand %p483_p0, %p477_p11 }
  0x21   :  { %487 = shalt.err (!%p484_p1)
}
  0x22   :  { %47 = dma.hbm_to_vmem [thread:$0]  %s639_s4, 2048, %s42_s24, [#allocation7], %s517_s19, %s517_s19, %s518_s20  }
  0x23   :  { %510 = dma.done.wait [#allocation4], 512  }
  0x24   :  { %511 = vsyncadd [#allocation4], 4294966784 }
  0x25   :  { %512 = dma.done.wait [#allocation7], 2048  }
  0x26   :  { %513 = vsyncadd [#allocation7], 4294965248  ;;  %v520_v0 = vmov 0.0|0.0   ;;  %vm521_vm0 = vmmov 0   ;;  %v522_v1 = vmov 0.0   ;;  %v63_v2 = vld [vmem:[#allocation3] sm:$0xff]  ;;  %v172_v43 = vlaneseq }
  0x27   :  { %397 = vmatprep.subr.bf16.mxu0 %v520_v0  ;;  %359 = vmatprep.mubr.msk.f32.mxu0 %vm521_vm0, %v522_v1  ;;  %v64_v3 = vld [vmem:[#allocation3 + $0x8] sm:$0xff]  ;;  %v65_v4 = vld [vmem:[#allocation3 + $0x10] sm:$0xff]  ;;  %v66_v6 = vld [vmem:[#allocation3 + $0x18] sm:$0xff]  ;;  %vm74_vm1 = vcmask 261120   ;;  %v523_v34 = vmov 0   ;;  %v524_v35 = vmov 2  }
  0x28   :  { %403 = vmatprep.subr.bf16.mxu1 %v520_v0  ;;  %394 = vmatprep.mubr.msk.f32.mxu1 %vm521_vm0, %v522_v1  ;;  %v398_v5 = vpack.c.bf16 %v64_v3, %v63_v2  ;;  %v149_v7 = vld [vmem:[#allocation6] sm:$0xff]  ;;  %v150_v8 = vld [vmem:[#allocation6 + $0x8] sm:$0xff]  ;;  %v151_v9 = vld [vmem:[#allocation6 + $0x10] sm:$0xff]  ;;  %v401_v11 = vpack.c.bf16 %v66_v6, %v65_v4  ;;  %v525_v36 = vmov 1   ;;  %v526_v37 = vmov 3   ;;  %s527_s22 = smov [#allocation8]  }
  0x29   :  { %v152_v10 = vld [vmem:[#allocation6 + $0x18] sm:$0xff]  ;;  %v404_v12 = vpack.c.bf16 %v150_v8, %v149_v7  ;;  %v153_v14 = vld [vmem:[#allocation6 + $0x20] sm:$0xff]  ;;  %v154_v15 = vld [vmem:[#allocation6 + $0x28] sm:$0xff]  ;;  %439 = vset.pattern.permute.xlu0 %v523_v34  ;;  %441 = vset.pattern.permute.xlu1 %v524_v35  ;;  %v173_v44 = vshrl.u32 %v172_v43, 7  ;;  %s315_s23 = sshll.u32 %s527_s22, 4  ;;  %vm307_vm2 = vcmask 57344   ;;  %s316_s23 = int_to_ptr.vmem [resolvable:$true] %s315_s23 }
  0x2a   :  { %399 = vmatpush3.bf16.msra.mxu0 %v398_v5  ;;  %v407_v13 = vpack.c.bf16 %v152_v10, %v151_v9  ;;  %v62_v16 = vld [vmem:[%s635_s0] sm:$0xff]  ;;  %v410_v17 = vpack.c.bf16 %v154_v15, %v153_v14  ;;  %v155_v18 = vld [vmem:[#allocation6 + $0x30] sm:$0xff]  ;;  %v156_v19 = vld [vmem:[#allocation6 + $0x38] sm:$0xff]  ;;  %v301_v9 = vand.u32 127, %v172_v43  ;;  %v297_v10 = vstv %s643_s8  ;;  %p493_p3 = scmp.lt.s32.totalorder %s316_s23, %s316_s23 }
  0x2b   :  { %400 = vmatprep.subr.bf16.mxu0 %v520_v0  ;;  %405 = vmatpush3.bf16.msra.mxu1 %v404_v12  ;;  %v413_v20 = vpack.c.bf16 %v156_v19, %v155_v18  ;;  %v157_v21 = vld [vmem:[#allocation6 + $0x40] sm:$0xff]  ;;  %v158_v22 = vld [vmem:[#allocation6 + $0x48] sm:$0xff]  ;;  %v159_v24 = vld [vmem:[#allocation6 + $0x50] sm:$0xff]  ;;  %v174_v46 = vsub.s32 0, %v173_v44  ;;  %v253_v47 = vsub.s32 1, %v173_v44  ;;  %v263_v51 = vsub.s32 2, %v173_v44 }
  0x2c   :  { %406 = vmatprep.subr.bf16.mxu1 %v520_v0  ;;  %v416_v23 = vpack.c.bf16 %v158_v22, %v157_v21  ;;  %v160_v25 = vld [vmem:[#allocation6 + $0x58] sm:$0xff]  ;;  %v161_v27 = vld [vmem:[#allocation6 + $0x60] sm:$0xff]  ;;  %v162_v28 = vld [vmem:[#allocation6 + $0x68] sm:$0xff]  ;;  %v273_v53 = vsub.s32 3, %v173_v44 }
  0x2d   :  { %v419_v26 = vpack.c.bf16 %v160_v25, %v159_v24  ;;  %v422_v29 = vpack.c.bf16 %v162_v28, %v161_v27  ;;  %v163_v30 = vld [vmem:[#allocation6 + $0x70] sm:$0xff]  ;;  %v164_v31 = vld [vmem:[#allocation6 + $0x78] sm:$0xff]  ;;  %v165_v33 = vld [vmem:[%s636_s1] sm:$0xff] }
  0x2e   :  { %402 = vmatpush3.bf16.msra.mxu0 %v401_v11  ;;  %v425_v32 = vpack.c.bf16 %v164_v31, %v163_v30  ;;  %169 = vperm.xlu0 %439, %v165_v33   ;;  %v325_v38 = vld [vmem:[%s638_s3] ss:$0 sm:$0xff]  ;;  %v304_v11 = vsub.s32 %v301_v9, %v173_v44 }
  0x2f   :  { %408 = vmatpush3.bf16.msra.mxu1 %v407_v13  ;;  %258 = vperm.xlu1 %441, %v165_v33   ;;  %v166_v48 = vld [vmem:[%s640_s5] sm:$0xf] }
  0x30   :  { %409 = vmatprep.subr.bf16.mxu1 %v520_v0  ;;  %v175_v50 = vrot.slane %v166_v48, %v174_v46  ;;  %v254_v52 = vrot.slane %v166_v48, %v253_v47  ;;  %v264_v56 = vrot.slane %v166_v48, %v263_v51  ;;  %v274_v58 = vrot.slane %v166_v48, %v273_v53  ;;  %v327_v3 = vld [vmem:[%s641_s6] ss:$0 sm:$0xff]  ;;  %s488_s6 = scalar_lea.vmem %s316_s23, 16 }
  0x31   :  { %360 = vmatmul.mubr.msk.f32.vlgmr.msra.gmra.mrb[0].mxu0 %vm74_vm1, %v62_v16  ;;  %v328_v6 = vld [vmem:[%s642_s7] ss:$0 sm:$0xff]  ;;  %p489_p2 = scmp.ne.s32.totalorder %s316_s23, %s488_s6  ;;  %s492_s7 = scalar_lea.vmem %s316_s23, 32 }
  0x32   :  { %440 = vset.pattern.permute.xlu0 %v525_v36  ;;  %p494_p4 = scmp.lt.s32.totalorder %s492_s7, %s488_s6 }
  0x33   :  { %411 = vmatpush3.bf16.msra.mxu1 %v410_v17  ;;  %442 = vset.pattern.permute.xlu1 %v526_v37 }
  0x34   :  { %412 = vmatprep.subr.bf16.mxu1 %v520_v0  ;;  %248 = vperm.xlu0 %440, %v165_v33   ;;  %p495_p5 = por %p494_p4, %p493_p3 }
  0x35   :  { %268 = vperm.xlu1 %442, %v165_v33  }
  0x36   :  { %p496_p6 = pnand %p495_p5, %p489_p2 }
  0x37   :  { %414 = vmatpush3.bf16.msra.mxu1 %v413_v20 }
  0x38   :  { %415 = vmatprep.subr.bf16.mxu1 %v520_v0  ;;  %443 = vset.pattern.permute.xlu0 %v526_v37 }
  0x3b   :  { %417 = vmatpush3.bf16.msra.mxu1 %v416_v23 }
  0x3c   :  { %418 = vmatprep.subr.bf16.mxu1 %v520_v0 }
  0x3f   :  { %420 = vmatpush3.bf16.msra.mxu1 %v419_v26 }
  0x40   :  { %421 = vmatprep.subr.bf16.mxu1 %v520_v0 }
  0x43   :  { %423 = vmatpush3.bf16.msra.mxu1 %v422_v29 }
  0x44   :  { %424 = vmatprep.subr.bf16.mxu1 %v520_v0 }
  0x47   :  { %426 = vmatpush3.bf16.msra.mxu1 %v425_v32 }
  0xad   :  { %v170_v45 = vpop.permute.xlu0 %169 }
  0xae   :  { %v259_v49 = vpop.permute.xlu1 %258  ;;  %v176_v55 = vmul.f32 %v175_v50, %v170_v45 }
  0xaf   :  { %v265_v63 = vmul.f32 %v264_v56, %v259_v49 }
  0xb3   :  { %v249_v54 = vpop.permute.xlu0 %248 }
  0xb4   :  { %v255_v57 = vmul.f32 %v254_v52, %v249_v54  ;;  %v269_v60 = vpop.permute.xlu1 %268 }
  0xb5   :  { %v275_v1 = vmul.f32 %v274_v58, %v269_v60 }
 0x104   :  { %v144_v39 = vpop.f32.mrb[0].mxu0 }
 0x105   :  { %v145_v40 = vadd.f32 %v325_v38, %v144_v39  ;;  %v361_v41 = vpop.f32.mrb[1].mxu0 }
 0x107   :  { %v148_v42 = vmax.f32 %v145_v40, 0.0 }
 0x109   :  { %395 = vmatmul.mubr.f32.vlgmr.msra.gmra.mrb[0].mxu1 %v148_v42 }
 0x1dc   :  { %v243_v59 = vpop.f32.mrb[0].mxu1 }
 0x1dd   :  { %v244_v61 = vadd.f32 %v243_v59, %v176_v55  ;;  %v396_v62 = vpop.f32.mrb[1].mxu1 }
 0x1df   :  { %v256_v0 = vadd.f32 %v255_v57, %v244_v61 }
 0x1e1   :  { %v266_v2 = vadd.f32 %v265_v63, %v256_v0 }
 0x1e3   :  { %v276_v4 = vadd.f32 %v275_v1, %v266_v2 }
 0x1e5   :  { %v284_v5 = vadd.f32 %v327_v3, %v276_v4 }
 0x1e7   :  { %v285_v7 = vmax.f32 %v284_v5, 0.0 }
 0x1e9   :  { %v293_v8 = vmul.f32 %v328_v6, %v285_v7 }
 0x1eb   :  { %294 = vadd.xlane.f32.xlu1 %v293_v8 }
 0x278   :  { %v295_v12 = vpop.xlane.xlu1 %294 }
 0x279   :  { %v298_v13 = vadd.f32 %v297_v10, %v295_v12 }
 0x27b   :  { %v305_v14 = vrot.slane %v298_v13, %v304_v11 }
 0x27d   :  { %308 = vst.msk [vmem:[#allocation8] sm:$0x1] %vm307_vm2, %v305_v14 }
 0x27e   :  { %499 = shalt.err (!%p496_p6)
}
 0x27f   :  { %s500_s8 = scalar_lea.hbm %s644_s9, 16 }
 0x280   :  { %p501_p7 = scmp.ne.s32.totalorder %s644_s9, %s500_s8  ;;  %p504_p8 = scmp.lt.u32.totalorder %s500_s8, %s644_s9 }
 0x282   :  { %p506_p9 = pnand %p504_p8, %p501_p7 }
 0x284   :  { %509 = shalt.err (!%p506_p9)
}
 0x285   :  { %318 = dma.vmem_to_hbm [thread:$0]  %s316_s23, 16, %s644_s9, [#allocation5]  }
 0x286   :  { %514 = dma.done.wait [#allocation5], 16  }
 0x287   :  { %515 = vsyncadd [#allocation5], 4294967280 }
 0x288   :  { %322 = vsyncpa [#allocation4], 1 }
 0x289   :  { %323 = vsyncpa [#allocation7], 1 }
 0x28a   :  { %324 = vsyncpa [#allocation5], 1 }

</bundles_post_ra>
